<compile_context>
chip_gen: v5e
topology: v5e:2x2
jax: 0.10.0
libtpu: 0.0.40
codegen_flags: <defaults>
</compile_context>

<pallas_src>
import functools

import jax
import jax.numpy as jnp
from jax import lax
from jax.experimental import pallas as pl
from jax.experimental.pallas import tpu as pltpu


def _physical_vmem_bytes():
    """Best-effort query of per-core VMEM capacity (falls back to 64 MiB)."""
    try:
        info = pltpu.get_tpu_info()
        cap = getattr(info, "vmem_capacity_bytes", None)
        if cap:
            return int(cap)
    except Exception:
        pass
    return 64 * 1024 * 1024  # conservative (v7x-sized)


# ---------------------------------------------------------------------------
# Fused single-pass kernel: pooling + SE MLP + scale apply on one VMEM slab.
# ---------------------------------------------------------------------------
def _fused_kernel(x_ref, w1t_ref, w2_ref, o_ref, *, inv_hw):
    x = x_ref[0]                                             # (C, HW), in dtype
    # Max pooling stays in the input dtype (exact); sum accumulates in f32.
    mx = jnp.max(x, axis=1, keepdims=True).astype(jnp.float32)           # (C,1)
    av = jnp.sum(x.astype(jnp.float32), axis=1, keepdims=True) * inv_hw  # (C,1)

    w1t = w1t_ref[...].astype(jnp.float32)                   # (C, hidden) = w1.T
    w2 = w2_ref[...].astype(jnp.float32)                     # (C, hidden)

    def se(v):                                               # v: (C, 1) f32
        # h[j] = sum_c w1[j, c] * v[c]  (sublane reduce; no matmul/transpose)
        h = jnp.sum(w1t * v, axis=0, keepdims=True)          # (1, hidden)
        h = jnp.maximum(h, 0.0)
        # out[c] = sum_j w2[c, j] * h[j]  (lane reduce)
        return jnp.sum(w2 * h, axis=1, keepdims=True)        # (C, 1)

    attn = jax.nn.sigmoid(se(mx) + se(av))                   # (C, 1) f32
    # Residual folded: x*attn + x == x*(attn + 1); one cast, one multiply.
    scale = (attn + 1.0).astype(x.dtype)
    o_ref[0] = (x * scale).astype(o_ref.dtype)


# ---------------------------------------------------------------------------
# Two-pass fallback for feature maps too large to hold per-batch in VMEM.
# ---------------------------------------------------------------------------
def _pool_kernel(x_ref, mx_ref, sm_ref, *, hw_tile, hw_valid, need_mask):
    # x block: (1, C, hw_tile); outputs: resident (1, C, 1) accumulators.
    h = pl.program_id(1)

    @pl.when(h == 0)
    def _():
        mx_ref[...] = jnp.full_like(mx_ref, -jnp.inf)
        sm_ref[...] = jnp.zeros_like(sm_ref)

    x = x_ref[0]                                             # (C, hw_tile)

    def accumulate(xm, xs):
        mx_ref[0] = jnp.maximum(
            mx_ref[0], jnp.max(xm, axis=1, keepdims=True).astype(jnp.float32))
        sm_ref[0] = sm_ref[0] + jnp.sum(
            xs.astype(jnp.float32), axis=1, keepdims=True)

    if need_mask:
        last = pl.num_programs(1) - 1

        @pl.when(h == last)          # only the ragged tail pays for masking
        def _():
            col = h * hw_tile + lax.broadcasted_iota(jnp.int32, x.shape, 1)
            valid = col < hw_valid
            neg_inf = jnp.array(-jnp.inf, dtype=x.dtype)
            accumulate(jnp.where(valid, x, neg_inf),
                       jnp.where(valid, x.astype(jnp.float32), 0.0))

        @pl.when(h != last)
        def _():
            accumulate(x, x)
    else:
        accumulate(x, x)


def _apply_kernel(x_ref, s_ref, o_ref):
    # out = x * (1 + sigmoid(se(max) + se(avg))); residual already folded into
    # s and s already in x's dtype -> single multiply per element.
    o_ref[0] = (x_ref[0] * s_ref[0]).astype(o_ref.dtype)


def cbam_block(x_nchw, w1, w2, *, _force_two_pass=False, _max_lanes=None):
    """CBAMBlock forward: out = x * ca(x) + x, ca = sigmoid(se(max)+se(avg)).

    w1: (C//r, C) first 1x1 conv weight, w2: (C, C//r) second 1x1 conv weight
    (both bias-free, as in the PyTorch module).  The underscore kwargs only
    exist so tests can force/exercise the two-pass fallback at small shapes.
    """
    B, C, H, W = x_nchw.shape
    HW = H * W
    dtype = x_nchw.dtype
    itemsize = jnp.dtype(dtype).itemsize
    hidden = w1.shape[0]

    phys_vmem = _physical_vmem_bytes()
    # <= 48 MiB on v7x (64 MiB physical VMEM), <= 96 MiB on v5e/v6e (128 MiB).
    vmem_limit = int(min(96 * 1024 * 1024, (phys_vmem * 3) // 4))

    # Collapsing H,W of a contiguous NCHW array is metadata-only (no HBM pass).
    x_flat = x_nchw.reshape(B, C, HW)

    slab_bytes = C * HW * itemsize
    # Per grid step the fused kernel holds ~4 slab-sized buffers (in + out,
    # double-buffered) plus up to ~2 f32 slab temporaries for the pooling.
    fused_fits = (4 * slab_bytes + 2 * C * HW * 4 + (1 << 20)) <= vmem_limit

    if fused_fits and not _force_two_pass:
        # NOTE: grid=(B,) is the only parallel axis; with B == 1 one TC idles
        # on v7x, but that is also the cheapest case so the loss is bounded.
        w1t = jnp.transpose(w1)                              # (C, hidden), tiny
        out_flat = pl.pallas_call(
            functools.partial(_fused_kernel, inv_hw=1.0 / HW),
            out_shape=jax.ShapeDtypeStruct((B, C, HW), dtype),
            grid_spec=pltpu.PrefetchScalarGridSpec(
                num_scalar_prefetch=0,
                grid=(B,),
                in_specs=[pl.BlockSpec((1, C, HW), lambda b: (b, 0, 0)),
                          pl.BlockSpec((C, hidden), lambda b: (0, 0)),
                          pl.BlockSpec((C, hidden), lambda b: (0, 0))],
                out_specs=pl.BlockSpec((1, C, HW), lambda b: (b, 0, 0)),
            ),
            compiler_params=pltpu.CompilerParams(
                dimension_semantics=("parallel",),
                vmem_limit_bytes=vmem_limit),
        )(x_flat, w1t, w2)
        return out_flat.reshape(B, C, H, W)

    # ---- two-pass streaming fallback ---------------------------------------
    # Lane-dense spatial tiles, up to ~8 MiB per block (phase 2 double-buffers
    # in + out, so ~4 blocks + headroom must fit under vmem_limit).
    blk_budget = min(8 * 1024 * 1024, vmem_limit // 6)
    lanes_budget = max(128, (blk_budget // (C * itemsize)) // 128 * 128)
    if _max_lanes is not None:
        lanes_budget = min(lanes_budget, _max_lanes)
    if HW <= lanes_budget:
        hw_tile = HW                       # full extent: legal, no masking
    else:
        hw_tile = lanes_budget             # multiple of 128, lane-dense
    n_hw = pl.cdiv(HW, hw_tile)
    need_mask = (HW % hw_tile) != 0        # only the ragged last tile is masked

    # phase 1: streaming max / f32-sum pooling (no input pad: ragged tail is
    # masked inside the kernel on the last tile only).
    mx, sm = pl.pallas_call(
        functools.partial(_pool_kernel, hw_tile=hw_tile, hw_valid=HW,
                          need_mask=need_mask),
        out_shape=(jax.ShapeDtypeStruct((B, C, 1), jnp.float32),
                   jax.ShapeDtypeStruct((B, C, 1), jnp.float32)),
        grid_spec=pltpu.PrefetchScalarGridSpec(
            num_scalar_prefetch=0,
            grid=(B, n_hw),
            in_specs=[pl.BlockSpec((1, C, hw_tile), lambda b, h: (b, 0, h))],
            out_specs=(pl.BlockSpec((1, C, 1), lambda b, h: (b, 0, 0)),
                       pl.BlockSpec((1, C, 1), lambda b, h: (b, 0, 0))),
        ),
        compiler_params=pltpu.CompilerParams(
            dimension_semantics=("parallel", "arbitrary"),
            vmem_limit_bytes=vmem_limit),
    )(x_flat)

    mx = mx[:, :, 0]                              # (B, C) f32
    av = sm[:, :, 0] / float(HW)                  # (B, C) f32

    # tiny shared SE MLP (negligible FLOPs; kept off the Pallas critical path)
    w1f = w1.astype(jnp.float32)
    w2f = w2.astype(jnp.float32)

    def se(v):                                    # (B, C) f32
        return jnp.maximum(v @ w1f.T, 0.0) @ w2f.T

    attn = jax.nn.sigmoid(se(mx) + se(av))        # (B, C) f32
    scale = (attn + 1.0).astype(dtype)[:, :, None]            # (B, C, 1)

    # phase 2: tiled elementwise apply (no output slice: OOB stores of the
    # ragged last tile are dropped by Pallas).
    out_flat = pl.pallas_call(
        _apply_kernel,
        out_shape=jax.ShapeDtypeStruct((B, C, HW), dtype),
        grid_spec=pltpu.PrefetchScalarGridSpec(
            num_scalar_prefetch=0,
            grid=(B, n_hw),
            in_specs=[pl.BlockSpec((1, C, hw_tile), lambda b, h: (b, 0, h)),
                      pl.BlockSpec((1, C, 1), lambda b, h: (b, 0, 0))],
            out_specs=pl.BlockSpec((1, C, hw_tile), lambda b, h: (b, 0, h)),
        ),
        compiler_params=pltpu.CompilerParams(
            dimension_semantics=("parallel", "parallel"),
            vmem_limit_bytes=vmem_limit),
    )(x_flat, scale)

    return out_flat.reshape(B, C, H, W)


if __name__ == "__main__":
    key = jax.random.PRNGKey(0)
    k_x, k_w1, k_w2, k_x2 = jax.random.split(key, 4)

    B, C, reduction = 2, 64, 16
    hidden = C // reduction  # 4

    # Deterministic kaiming-like init for the bias-free 1x1 conv weights.
    w1 = jax.random.normal(k_w1, (hidden, C), dtype=jnp.float32) * (2.0 / C) ** 0.5
    w2 = jax.random.normal(k_w2, (C, hidden), dtype=jnp.float32) * (2.0 / hidden) ** 0.5

    def reference(x):
        mx_r = jnp.max(x, axis=(2, 3))
        av_r = jnp.mean(x, axis=(2, 3))
        se_r = lambda v: jnp.maximum(v @ w1.T, 0.0) @ w2.T
        attn_r = jax.nn.sigmoid(se_r(mx_r) + se_r(av_r))
        return x * attn_r[:, :, None, None] + x

    # Case 1: fused single-pass path (per-batch slab resident in VMEM).
    x1 = jax.random.normal(k_x, (B, C, 16, 16), dtype=jnp.float32)
    out1 = jax.block_until_ready(cbam_block(x1, w1, w2))
    assert out1.shape == x1.shape
    assert jnp.allclose(out1, reference(x1), atol=1e-5, rtol=1e-5)

    # Case 2: two-pass streaming path with a ragged, masked last spatial tile
    # (HW = 144 split into 128-lane tiles) -- validates the large-map fallback.
    x2 = jax.random.normal(k_x2, (B, C, 12, 12), dtype=jnp.float32)
    out2 = jax.block_until_ready(
        cbam_block(x2, w1, w2, _force_two_pass=True, _max_lanes=128))
    assert out2.shape == x2.shape
    assert jnp.allclose(out2, reference(x2), atol=1e-5, rtol=1e-5)

    print("KERNEL_OK")
</pallas_src>

<mosaic_0001>
module attributes {stable_mosaic.version = 11 : i64} {
  func.func @_fused_kernel(%arg0: i32, %arg1: memref<1x64x256xf32, #tpu.memory_space<vmem>>, %arg2: memref<64x4xf32, #tpu.memory_space<vmem>>, %arg3: memref<64x4xf32, #tpu.memory_space<vmem>>, %arg4: memref<1x64x256xf32, #tpu.memory_space<vmem>>) attributes {dimension_semantics = [#tpu.dimension_semantics<parallel>], iteration_bounds = array<i64: 2>, scalar_prefetch = 0 : i64, scratch_operands = 0 : i64, tpu.core_type = #tpu.core_type<tc>, window_params = [{transform_indices = @transform_0, window_bounds = array<i64: 1, 64, 256>}, {pipeline_mode = #tpu.pipeline_mode<synchronous>, transform_indices = @transform_1, window_bounds = array<i64: 64, 4>}, {pipeline_mode = #tpu.pipeline_mode<synchronous>, transform_indices = @transform_2, window_bounds = array<i64: 64, 4>}, {transform_indices = @transform_3, window_bounds = array<i64: 1, 64, 256>}]} {
    %c0 = arith.constant 0 : index
    %c0_0 = arith.constant 0 : index
    %c0_1 = arith.constant 0 : index
    %0 = vector.load %arg1[%c0, %c0_0, %c0_1] : memref<1x64x256xf32, #tpu.memory_space<vmem>>, vector<1x64x256xf32>
    %1 = vector.shape_cast %0 : vector<1x64x256xf32> to vector<64x256xf32>
    %cst = arith.constant dense<0xFF800000> : vector<64xf32>
    %2 = vector.multi_reduction <maximumf>, %1, %cst [1] : vector<64x256xf32> to vector<64xf32>
    %3 = vector.shape_cast %2 : vector<64xf32> to vector<64x1xf32>
    %cst_2 = arith.constant dense<0.000000e+00> : vector<64xf32>
    %4 = vector.multi_reduction <add>, %1, %cst_2 [1] : vector<64x256xf32> to vector<64xf32>
    %5 = vector.shape_cast %4 : vector<64xf32> to vector<64x1xf32>
    %cst_3 = arith.constant 3.906250e-03 : f32
    %6 = vector.broadcast %cst_3 : f32 to vector<64x1xf32>
    %7 = arith.mulf %5, %6 : vector<64x1xf32>
    %c0_4 = arith.constant 0 : index
    %c0_5 = arith.constant 0 : index
    %8 = vector.load %arg2[%c0_4, %c0_5] : memref<64x4xf32, #tpu.memory_space<vmem>>, vector<64x4xf32>
    %c0_6 = arith.constant 0 : index
    %c0_7 = arith.constant 0 : index
    %9 = vector.load %arg3[%c0_6, %c0_7] : memref<64x4xf32, #tpu.memory_space<vmem>>, vector<64x4xf32>
    %10 = vector.broadcast %3 : vector<64x1xf32> to vector<64x4xf32>
    %11 = arith.mulf %8, %10 : vector<64x4xf32>
    %cst_8 = arith.constant dense<0.000000e+00> : vector<4xf32>
    %12 = vector.multi_reduction <add>, %11, %cst_8 [0] : vector<64x4xf32> to vector<4xf32>
    %13 = vector.shape_cast %12 : vector<4xf32> to vector<1x4xf32>
    %cst_9 = arith.constant 0.000000e+00 : f32
    %14 = vector.broadcast %cst_9 : f32 to vector<1x4xf32>
    %15 = arith.maximumf %13, %14 : vector<1x4xf32>
    %16 = vector.broadcast %15 : vector<1x4xf32> to vector<64x4xf32>
    %17 = arith.mulf %9, %16 : vector<64x4xf32>
    %cst_10 = arith.constant dense<0.000000e+00> : vector<64xf32>
    %18 = vector.multi_reduction <add>, %17, %cst_10 [1] : vector<64x4xf32> to vector<64xf32>
    %19 = vector.shape_cast %18 : vector<64xf32> to vector<64x1xf32>
    %20 = vector.broadcast %7 : vector<64x1xf32> to vector<64x4xf32>
    %21 = arith.mulf %8, %20 : vector<64x4xf32>
    %cst_11 = arith.constant dense<0.000000e+00> : vector<4xf32>
    %22 = vector.multi_reduction <add>, %21, %cst_11 [0] : vector<64x4xf32> to vector<4xf32>
    %23 = vector.shape_cast %22 : vector<4xf32> to vector<1x4xf32>
    %cst_12 = arith.constant 0.000000e+00 : f32
    %24 = vector.broadcast %cst_12 : f32 to vector<1x4xf32>
    %25 = arith.maximumf %23, %24 : vector<1x4xf32>
    %26 = vector.broadcast %25 : vector<1x4xf32> to vector<64x4xf32>
    %27 = arith.mulf %9, %26 : vector<64x4xf32>
    %cst_13 = arith.constant dense<0.000000e+00> : vector<64xf32>
    %28 = vector.multi_reduction <add>, %27, %cst_13 [1] : vector<64x4xf32> to vector<64xf32>
    %29 = vector.shape_cast %28 : vector<64xf32> to vector<64x1xf32>
    %30 = arith.addf %19, %29 : vector<64x1xf32>
    %31 = arith.negf %30 : vector<64x1xf32>
    %32 = math.exp %31 : vector<64x1xf32>
    %cst_14 = arith.constant 1.000000e+00 : f32
    %33 = vector.broadcast %cst_14 : f32 to vector<64x1xf32>
    %34 = arith.addf %33, %32 : vector<64x1xf32>
    %35 = arith.divf %33, %34 : vector<64x1xf32>
    %cst_15 = arith.constant 1.000000e+00 : f32
    %36 = vector.broadcast %cst_15 : f32 to vector<64x1xf32>
    %37 = arith.addf %35, %36 : vector<64x1xf32>
    %38 = vector.broadcast %37 : vector<64x1xf32> to vector<64x256xf32>
    %39 = arith.mulf %1, %38 : vector<64x256xf32>
    %c0_16 = arith.constant 0 : index
    %c0_17 = arith.constant 0 : index
    %c0_18 = arith.constant 0 : index
    %40 = vector.load %arg4[%c0_16, %c0_17, %c0_18] : memref<1x64x256xf32, #tpu.memory_space<vmem>>, vector<1x64x256xf32>
    %41 = vector.shape_cast %40 : vector<1x64x256xf32> to vector<64x256xf32>
    %42 = vector.shape_cast %39 : vector<64x256xf32> to vector<1x64x256xf32>
    tpu.vector_store %arg4[%c0_16, %c0_17, %c0_18], %42 {strides = array<i32>} : memref<1x64x256xf32, #tpu.memory_space<vmem>>, vector<1x64x256xf32>,
    return
  }
  func.func @transform_0(%arg0: i32) -> (i32, i32, i32) {
    %c0_i32 = arith.constant 0 : i32
    %c0_i32_0 = arith.constant 0 : i32
    %c0_i32_1 = arith.constant 0 : i32
    return %arg0, %c0_i32, %c0_i32_0 : i32, i32, i32
  }
  func.func @transform_1(%arg0: i32) -> (i32, i32) {
    %c0_i32 = arith.constant 0 : i32
    %c0_i32_0 = arith.constant 0 : i32
    %c0_i32_1 = arith.constant 0 : i32
    return %c0_i32, %c0_i32_0 : i32, i32
  }
  func.func @transform_2(%arg0: i32) -> (i32, i32) {
    %c0_i32 = arith.constant 0 : i32
    %c0_i32_0 = arith.constant 0 : i32
    %c0_i32_1 = arith.constant 0 : i32
    return %c0_i32, %c0_i32_0 : i32, i32
  }
  func.func @transform_3(%arg0: i32) -> (i32, i32, i32) {
    %c0_i32 = arith.constant 0 : i32
    %c0_i32_0 = arith.constant 0 : i32
    %c0_i32_1 = arith.constant 0 : i32
    return %arg0, %c0_i32, %c0_i32_0 : i32, i32, i32
  }
}

</mosaic_0001>

<bundles_post_ra>
// kernel: tpu_custom_call.1
= control target key start
LH: loop header
LB: loop body
LE: loop exit
PB: predicated region body
PF: predicated region fallthrough
CT: control target
= control target key end

     0   :  { %8 = vsyncpa [#allocation3], 0  ;;  %s1329_s0 = inlined_call_operand.hbm [shape: f32[2,64,256], index: 0, kind: input, shape index: {}]   ;;  %s1330_s1 = inlined_call_operand.vmem [shape: f32[64,4], index: 1, kind: input, shape index: {}]   ;;  %s1331_s2 = inlined_call_operand.vmem [shape: f32[64,4], index: 2, kind: input, shape index: {}]   ;;  %s1332_s3 = inlined_call_operand.hbm [shape: f32[2,64,256], index: 3, kind: output, shape index: {}]  }
   0x1   :  { %10 = vsyncpa [#allocation3 + $0x1], 0 }
   0x2   :  { %11 = vsyncpa [#allocation4], 0 }
   0x3   :  { %13 = vsyncpa [#allocation4 + $0x1], 0  ;;  %s921_s12 = smov 0   ;;  %s923_s13 = smov 0  }
   0x4   :  { %s925_s14 = smov 0   ;;  %s927_s15 = smov 0  }
   0x5 LB: > { %s942_s16 = sadd.s32 4294967295, %s895_s15   ;;  %s693_s17 = sadd.s32 4294967294, %s895_s15   ;;  %s895_s15 = sphi %s927_s15, %s1350_s15   ;;  %s891_s14 = sphi %s925_s14, %s1349_s14   ;;  %s887_s13 = sphi %s923_s13, %s1348_s13   ;;  %s883_s12 = sphi %s921_s12, %s1347_s12  }
   0x6   : > { %s946_s18 = sadd.s32 1, %s895_s15   ;;  %s26_s19 = sadd.s32 1, %s891_s14 }
   0x7   : > { %s23_s20 = ssub.s32 %s895_s15, %s946_s18  ;;  %p33_p0 = scmp.ne.s32.totalorder %s891_s14, %s887_s13 }
   0x8   : > { %p24_p1 = scmp.eq.s32.totalorder %s23_s20, 0  ;;  %p34_p2 = scmp.eq.s32.totalorder %s895_s15, 0 }
   0x9   : > { %p39_p3 = scmp.ne.s32.totalorder %s887_s13, %s883_s12  ;;  %p40_p4 = scmp.eq.s32.totalorder %s942_s16, 0 }
   0xa   : > { %s958_s21 = scalar_select %p24_p1, %s891_s14, %s26_s19  }
   0xb   : > { %p960_p5 = por %p34_p2, %p33_p0  ;;  %p964_p6 = por %p40_p4, %p39_p3 }
   0xc   : > { %p105_p7 = scmp.eq.s32.totalorder %s942_s16, 1  ;;  %p111_p8 = scmp.eq.s32.totalorder %s693_s17, 1 }
   0xd   : > { %p729_p10 = scmp.lt.s32.totalorder %s895_s15, 2  ;;  %s137_s26 = sand.u32 1, %s891_s14  }
   0xe   : > { %p971_p11 = por %p105_p7, %p33_p0  ;;  %p975_p12 = por %p111_p8, %p39_p3 }
   0xf   : > { %s715_s27 = sshll.u32 %s895_s15, 7  ;;  %s696_s28 = sshll.u32 %s137_s26, 7 }
  0x10   : > { %s146_s4 = scalar_lea.hbm %s1329_s0, %s715_s27  ;;  %s141_s6 = scalar_lea.vmem [#allocation2], %s696_s28 }
  0x11   : > { %s147_s5 = sshll.u32 %s146_s4, 4  ;;  %s149_s7 = sshll.u32 %s141_s6, 4  ;;  %s148_s5 = int_to_ptr.hbm [resolvable:$true] %s147_s5  ;;  %s150_s7 = int_to_ptr.vmem [resolvable:$true] %s149_s7 }
  0x12   : > { %p986_p13 = pnand %p729_p10, %p960_p5  ;;  %p699_p0 = scmp.ge.s32.totalorder %s895_s15, 1 }
  0x13   : > { %p157_p1 = scmp.lt.s32.totalorder %s895_s15, 3  ;;  %s138_s9 = scalar_lea.sflag [#allocation3], %s137_s26 }
  0x14   : > { %s799_s10 = sshra.s32 %s148_s5, 4  ;;  %p803_p3 = pneg %p986_p13  ;;  %s800_s10 = int_to_ptr.hbm [resolvable:$true] %s799_s10 }
  0x15   : > { %s801_s11 = scalar_lea.hbm %s800_s10, 128  ;;  %s806_s20 = scalar_lea.hbm %s1329_s0, 256 }
  0x16   : > { %p802_p2 = scmp.ne.s32.totalorder %s800_s10, %s801_s11  ;;  %p807_p5 = scmp.lt.s32.totalorder %s800_s10, %s1329_s0 }
  0x17   : > { %p808_p8 = scmp.lt.s32.totalorder %s806_s20, %s801_s11 }
  0x18   : > { %p804_p4 = pnand %p803_p3, %p802_p2 }
  0x19   : > { %p809_p10 = por %p808_p8, %p807_p5 }
  0x1a   : > { %p805_p7 = pneg %p804_p4 }
  0x1c   : > { %p810_p9 = pnand %p809_p10, %p805_p7 }
  0x1e   : > { %813 = shalt.err (!%p810_p9)
}
  0x1f   : > { %s897_s26 = smov 256   ;;  %s898_s28 = smov 16  }
  0x20   : > { %724 = dma.hbm_to_vmem [thread:$0]  (!%p986_p13), %s148_s5, 2048, %s150_s7, %s138_s9, %s897_s26, %s897_s26, %s898_s28  }
  0x21   : > { %p158_p2 = pnand %p699_p0, %p157_p1 }
  0x22   : > { %s1007_s29 = sand.u32 (!%p158_p2), 1, %s887_s13  }
  0x23   : > { %161 = sbr.rel (%p158_p2) target bundleno = 428 (0x1ac), region = 32  ;;  %s700_s30 = sshll.u32 (!%p158_p2), %s1007_s29, 7 }
  0x24   : > { %s164_s4 = scalar_lea.sflag (!%p158_p2), [#allocation3], %s1007_s29  ;;  %s1013_s6 = scalar_lea.vmem (!%p158_p2), [#allocation2], %s700_s30 }
  0x28   : > { %874 = dma.done.wait (%p964_p6), %s164_s4, 2048  }
  0x29   : > { %876 = vsyncadd (%p964_p6), %s164_s4, 4294965248  ;;  %v1020_v0 = vld [vmem:[%s1013_s6] sm:$0xff]  ;;  %v1023_v1 = vld [vmem:[%s1013_s6 + $0x8] sm:$0xff]  ;;  %vm287_vm0 = vcmask 31744   ;;  %s1223_s23 = scalar_lea.vmem [#allocation5], %s700_s30  ;;  %s716_s30 = sshll.u32 %s942_s16, 7 }
  0x2a   : > { %v1026_v2 = vld [vmem:[%s1013_s6 + $0x20] sm:$0xff]  ;;  %v231_v3 = vadd.f32 %v1023_v1, %v1020_v0  ;;  %v207_v4 = vmax.f32 %v1020_v0, %v1023_v1  ;;  %v1033_v5 = vld [vmem:[%s1013_s6 + $0x28] sm:$0xff]  ;;  %v1038_v7 = vld [vmem:[%s1013_s6 + $0x10] sm:$0xff]  ;;  %s616_s8 = scalar_lea.hbm %s1332_s3, %s716_s30  ;;  %s617_s9 = sshll.u32 %s1223_s23, 4  ;;  %s618_s9 = int_to_ptr.vmem [resolvable:$true] %s617_s9 }
  0x2b   : > { %v237_v6 = vadd.f32 %v1033_v5, %v1026_v2  ;;  %v1041_v8 = vld [vmem:[%s1013_s6 + $0x18] sm:$0xff]  ;;  %v213_v11 = vmax.f32 %v1026_v2, %v1033_v5  ;;  %v1050_v12 = vld [vmem:[%s1013_s6 + $0x30] sm:$0xff]  ;;  %v1056_v14 = vld [vmem:[%s1013_s6 + $0x40] sm:$0xff]  ;;  %s619_s16 = sshll.u32 %s616_s8, 4  ;;  %s605_s10 = scalar_lea.sflag [#allocation4], %s1007_s29  ;;  %s620_s16 = int_to_ptr.hbm [resolvable:$true] %s619_s16 }
  0x2c   : > { %232 = vadd.xlane.f32.xlu0 %v231_v3  ;;  %208 = vmax.xlane.f32.xlu1 %v207_v4  ;;  %v234_v9 = vadd.f32 %v1041_v8, %v1038_v7  ;;  %v210_v10 = vmax.f32 %v1038_v7, %v1041_v8  ;;  %v1053_v13 = vld [vmem:[%s1013_s6 + $0x38] sm:$0xff]  ;;  %v1059_v15 = vld [vmem:[%s1013_s6 + $0x48] sm:$0xff]  ;;  %v1068_v19 = vld [vmem:[%s1013_s6 + $0x50] sm:$0xff]  ;;  %s843_s11 = sshra.s32 %s620_s16, 4  ;;  %s849_s22 = scalar_lea.hbm %s1332_s3, 256  ;;  %s844_s11 = int_to_ptr.hbm [resolvable:$true] %s843_s11 }
  0x2d   : > { %238 = vadd.xlane.f32.xlu2 %v237_v6  ;;  %v240_v16 = vadd.f32 %v1053_v13, %v1050_v12  ;;  %v216_v17 = vmax.f32 %v1050_v12, %v1053_v13  ;;  %v243_v18 = vadd.f32 %v1059_v15, %v1056_v14  ;;  %v1071_v20 = vld [vmem:[%s1013_s6 + $0x58] sm:$0xff]  ;;  %v219_v21 = vmax.f32 %v1056_v14, %v1059_v15  ;;  %v1080_v24 = vld [vmem:[%s1013_s6 + $0x60] sm:$0xff]  ;;  %v1083_v25 = vld [vmem:[%s1013_s6 + $0x68] sm:$0xff]  ;;  %s845_s17 = scalar_lea.hbm %s844_s11, 128  ;;  %p850_p0 = scmp.lt.s32.totalorder %s844_s11, %s1332_s3 }
  0x2e   : > { %v246_v22 = vadd.f32 %v1071_v20, %v1068_v19  ;;  %v222_v23 = vmax.f32 %v1068_v19, %v1071_v20  ;;  %v1086_v26 = vld [vmem:[%s1013_s6 + $0x70] sm:$0xff]  ;;  %v1089_v27 = vld [vmem:[%s1013_s6 + $0x78] sm:$0xff]  ;;  %v249_v28 = vadd.f32 %v1083_v25, %v1080_v24  ;;  %v225_v29 = vmax.f32 %v1080_v24, %v1083_v25  ;;  %v263_v40 = vld [vmem:[%s1330_s1] sm:$0xff]  ;;  %p846_p6 = scmp.ne.s32.totalorder %s844_s11, %s845_s17  ;;  %p851_p1 = scmp.lt.s32.totalorder %s849_s22, %s845_s17 }
  0x2f   : > { %v252_v30 = vadd.f32 %v1089_v27, %v1086_v26  ;;  %v228_v31 = vmax.f32 %v1086_v26, %v1089_v27  ;;  %v264_v41 = vld [vmem:[%s1330_s1 + $0x8] sm:$0xff]  ;;  %v265_v49 = vld [vmem:[%s1330_s1 + $0x10] sm:$0xff]  ;;  %v266_v53 = vld [vmem:[%s1330_s1 + $0x18] sm:$0xff] }
  0x30   : > { %v267_v59 = vld [vmem:[%s1330_s1 + $0x20] sm:$0xff]  ;;  %p847_p9 = pnand %p846_p6, %p971_p11  ;;  %p852_p3 = por %p851_p1, %p850_p0 }
  0x32   : > { %p848_p13 = pneg %p847_p9 }
  0x34   : > { %235 = vadd.xlane.f32.xlu0 %v234_v9  ;;  %211 = vmax.xlane.f32.xlu1 %v210_v10  ;;  %v268_v9 = vld [vmem:[%s1330_s1 + $0x28] sm:$0xff]  ;;  %p853_p4 = pnand %p852_p3, %p848_p13 }
  0x35   : > { %214 = vmax.xlane.f32.xlu2 %v213_v11 }
  0x3c   : > { %241 = vadd.xlane.f32.xlu0 %v240_v16  ;;  %217 = vmax.xlane.f32.xlu1 %v216_v17 }
  0x3d   : > { %244 = vadd.xlane.f32.xlu2 %v243_v18 }
  0x44   : > { %220 = vmax.xlane.f32.xlu0 %v219_v21  ;;  %247 = vadd.xlane.f32.xlu1 %v246_v22 }
  0x45   : > { %223 = vmax.xlane.f32.xlu2 %v222_v23 }
  0x4c   : > { %250 = vadd.xlane.f32.xlu0 %v249_v28  ;;  %226 = vmax.xlane.f32.xlu1 %v225_v29 }
  0x4d   : > { %253 = vadd.xlane.f32.xlu2 %v252_v30 }
  0x54   : > { %229 = vmax.xlane.f32.xlu0 %v228_v31 }
  0x9f   : > { %v233_v32 = vpop.xlane.xlu0 %232  ;;  %v209_v33 = vpop.xlane.xlu1 %208 }
  0xa0   : > { %v239_v34 = vpop.xlane.xlu2 %238  ;;  %v255_v39 = vmul.f32 0.00390625, %v233_v32  ;;  %v279_v55 = vmul.f32 %v263_v40, %v209_v33 }
  0xa1   : > { %v257_v44 = vmul.f32 0.00390625, %v239_v34  ;;  %v269_v34 = vld [vmem:[%s1330_s1 + $0x30] sm:$0xff] }
  0xa2   : > { %v342_v47 = vmul.f32 %v263_v40, %v255_v39  ;;  %v288_v10 = vsel %vm287_vm0, %v279_v55, 0.0 }
  0xa3   : > { %v344_v52 = vmul.f32 %v265_v49, %v257_v44 }
  0xa4   : > { %v350_v54 = vsel %vm287_vm0, %v342_v47, 0.0 }
  0xa5   : > { %v353_v63 = vsel %vm287_vm0, %v344_v52, 0.0 }
  0xa7   : > { %v236_v35 = vpop.xlane.xlu0 %235  ;;  %v212_v36 = vpop.xlane.xlu1 %211 }
  0xa8   : > { %v215_v37 = vpop.xlane.xlu2 %214  ;;  %v256_v38 = vmul.f32 0.00390625, %v236_v35  ;;  %v280_v51 = vmul.f32 %v264_v41, %v212_v36 }
  0xa9   : > { %v281_v3 = vmul.f32 %v265_v49, %v215_v37 }
  0xaa   : > { %v343_v45 = vmul.f32 %v264_v41, %v256_v38  ;;  %v289_v62 = vsel %vm287_vm0, %v280_v51, 0.0  ;;  %v270_v41 = vld [vmem:[%s1330_s1 + $0x38] sm:$0xff] }
  0xab   : > { %v290_v18 = vadd.f32 %v289_v62, %v288_v10  ;;  %v291_v22 = vsel %vm287_vm0, %v281_v3, 0.0 }
  0xac   : > { %v351_v50 = vsel %vm287_vm0, %v343_v45, 0.0 }
  0xad   : > { %v352_v58 = vadd.f32 %v351_v50, %v350_v54  ;;  %v292_v32 = vadd.f32 %v291_v22, %v290_v18  ;;  %v272_v22 = vld [vmem:[%s1331_s2 + $0x8] sm:$0xff] }
  0xaf   : > { %v242_v42 = vpop.xlane.xlu0 %241  ;;  %v218_v43 = vpop.xlane.xlu1 %217  ;;  %v354_v21 = vadd.f32 %v353_v63, %v352_v58 }
  0xb0   : > { %v245_v46 = vpop.xlane.xlu2 %244  ;;  %v258_v48 = vmul.f32 0.00390625, %v242_v42  ;;  %v282_v16 = vmul.f32 %v266_v53, %v218_v43 }
  0xb1   : > { %v259_v57 = vmul.f32 0.00390625, %v245_v46 }
  0xb2   : > { %v345_v56 = vmul.f32 %v266_v53, %v258_v48  ;;  %v293_v30 = vsel %vm287_vm0, %v282_v16, 0.0 }
  0xb3   : > { %v346_v17 = vmul.f32 %v267_v59, %v259_v57  ;;  %v294_v42 = vadd.f32 %v293_v30, %v292_v32 }
  0xb4   : > { %v355_v11 = vsel %vm287_vm0, %v345_v56, 0.0 }
  0xb5   : > { %v356_v29 = vadd.f32 %v355_v11, %v354_v21  ;;  %v357_v31 = vsel %vm287_vm0, %v346_v17, 0.0  ;;  %v273_v21 = vld [vmem:[%s1331_s2 + $0x10] sm:$0xff] }
  0xb7   : > { %v221_v60 = vpop.xlane.xlu0 %220  ;;  %v248_v61 = vpop.xlane.xlu1 %247  ;;  %v358_v43 = vadd.f32 %v357_v31, %v356_v29 }
  0xb8   : > { %v260_v4 = vmul.f32 0.00390625, %v248_v61  ;;  %v224_v6 = vpop.xlane.xlu2 %223  ;;  %v283_v23 = vmul.f32 %v267_v59, %v221_v60 }
  0xb9   : > { %v284_v37 = vmul.f32 %v268_v9, %v224_v6 }
  0xba   : > { %v347_v28 = vmul.f32 %v268_v9, %v260_v4  ;;  %v295_v36 = vsel %vm287_vm0, %v283_v23, 0.0  ;;  %v271_v23 = vld [vmem:[%s1331_s2] sm:$0xff] }
  0xbb   : > { %v296_v47 = vadd.f32 %v295_v36, %v294_v42  ;;  %v297_v50 = vsel %vm287_vm0, %v284_v37, 0.0  ;;  %v275_v36 = vld [vmem:[%s1331_s2 + $0x20] sm:$0xff] }
  0xbc   : > { %v359_v38 = vsel %vm287_vm0, %v347_v28, 0.0 }
  0xbd   : > { %v360_v48 = vadd.f32 %v359_v38, %v358_v43  ;;  %v298_v55 = vadd.f32 %v297_v50, %v296_v47 }
  0xbf   : > { %v251_v33 = vpop.xlane.xlu0 %250  ;;  %v227_v35 = vpop.xlane.xlu1 %226 }
  0xc0   : > { %v261_v39 = vmul.f32 0.00390625, %v251_v33  ;;  %v254_v40 = vpop.xlane.xlu2 %253  ;;  %v285_v46 = vmul.f32 %v269_v34, %v227_v35  ;;  %v276_v35 = vld [vmem:[%s1331_s2 + $0x28] sm:$0xff] }
  0xc1   : > { %v262_v44 = vmul.f32 0.00390625, %v254_v40  ;;  %v274_v40 = vld [vmem:[%s1331_s2 + $0x18] sm:$0xff] }
  0xc2   : > { %v348_v45 = vmul.f32 %v269_v34, %v261_v39  ;;  %v299_v53 = vsel %vm287_vm0, %v285_v46, 0.0  ;;  %v278_v46 = vld [vmem:[%s1331_s2 + $0x38] sm:$0xff] }
  0xc3   : > { %v349_v49 = vmul.f32 %v270_v41, %v262_v44  ;;  %v300_v58 = vadd.f32 %v299_v53, %v298_v55 }
  0xc4   : > { %v361_v51 = vsel %vm287_vm0, %v348_v45, 0.0 }
  0xc5   : > { %v362_v52 = vadd.f32 %v361_v51, %v360_v48  ;;  %v363_v54 = vsel %vm287_vm0, %v349_v49, 0.0  ;;  %v277_v49 = vld [vmem:[%s1331_s2 + $0x30] sm:$0xff] }
  0xc7   : > { %v230_v56 = vpop.xlane.xlu0 %229  ;;  %v364_v59 = vadd.f32 %v363_v54, %v362_v52 }
  0xc8   : > { %v286_v57 = vmul.f32 %v270_v41, %v230_v56 }
  0xc9   : > { %v365_v63 = vrot.slane %v364_v59, 4 }
  0xca   : > { %v301_v60 = vsel %vm287_vm0, %v286_v57, 0.0 }
  0xcb   : > { %v302_v61 = vadd.f32 %v301_v60, %v300_v58  ;;  %v366_v6 = vadd.f32 %v365_v63, %v364_v59 }
  0xcd   : > { %v303_v62 = vrot.slane %v302_v61, 4  ;;  %v367_v11 = vrot.slane %v366_v6, 2 }
  0xcf   : > { %v304_v3 = vadd.f32 %v303_v62, %v302_v61  ;;  %v368_v18 = vadd.f32 %v367_v11, %v366_v6 }
  0xd1   : > { %v305_v4 = vrot.slane %v304_v3, 2  ;;  %v369_v31 = vrot.slane %v368_v18, 1 }
  0xd3   : > { %v306_v9 = vadd.f32 %v305_v4, %v304_v3  ;;  %v370_v37 = vadd.f32 %v369_v31, %v368_v18 }
  0xd5   : > { %v307_v10 = vrot.slane %v306_v9, 1  ;;  %v371_v42 = vmax.f32 %v370_v37, 0.0 }
  0xd7   : > { %v308_v16 = vadd.f32 %v307_v10, %v306_v9  ;;  %v372_v47 = vmul.f32 %v371_v42, %v271_v23  ;;  %v375_v54 = vmul.f32 %v371_v42, %v274_v40  ;;  %v374_v55 = vmul.f32 %v371_v42, %v273_v21 }
  0xd8   : > { %v373_v56 = vmul.f32 %v371_v42, %v272_v22  ;;  %v378_v60 = vmul.f32 %v371_v42, %v277_v49  ;;  %v377_v61 = vmul.f32 %v371_v42, %v276_v35  ;;  %v376_v62 = vmul.f32 %v371_v42, %v275_v36 }
  0xd9   : > { %v309_v17 = vmax.f32 %v308_v16, 0.0  ;;  %v380_v51 = vsel %vm287_vm0, %v372_v47, 0.0  ;;  %v389_v57 = vsel %vm287_vm0, %v375_v54, 0.0  ;;  %v386_v58 = vsel %vm287_vm0, %v374_v55, 0.0 }
  0xda   : > { %v383_v59 = vsel %vm287_vm0, %v373_v56, 0.0  ;;  %v398_v63 = vsel %vm287_vm0, %v378_v60, 0.0  ;;  %v395_v3 = vsel %vm287_vm0, %v377_v61, 0.0  ;;  %v392_v4 = vsel %vm287_vm0, %v376_v62, 0.0 }
  0xdb   : > { %v312_v28 = vmul.f32 %v309_v17, %v273_v21  ;;  %v311_v29 = vmul.f32 %v309_v17, %v272_v22  ;;  %v310_v30 = vmul.f32 %v309_v17, %v271_v23  ;;  %v315_v38 = vmul.f32 %v309_v17, %v276_v35 }
  0xdc   : > { %v314_v39 = vmul.f32 %v309_v17, %v275_v36  ;;  %v313_v41 = vmul.f32 %v309_v17, %v274_v40  ;;  %v317_v48 = vmul.f32 %v309_v17, %v278_v46  ;;  %v316_v50 = vmul.f32 %v309_v17, %v277_v49 }
  0xdd   : > { %v324_v32 = vsel %vm287_vm0, %v312_v28, 0.0  ;;  %v321_v33 = vsel %vm287_vm0, %v311_v29, 0.0  ;;  %v318_v34 = vsel %vm287_vm0, %v310_v30, 0.0  ;;  %v333_v43 = vsel %vm287_vm0, %v315_v38, 0.0 }
  0xde   : > { %325 = vadd.xlane.f32.xlu0 %v324_v32  ;;  %322 = vadd.xlane.f32.xlu2 %v321_v33  ;;  %v330_v44 = vsel %vm287_vm0, %v314_v39, 0.0  ;;  %v327_v45 = vsel %vm287_vm0, %v313_v41, 0.0  ;;  %v339_v52 = vsel %vm287_vm0, %v317_v48, 0.0  ;;  %v336_v53 = vsel %vm287_vm0, %v316_v50, 0.0 }
  0xdf   : > { %319 = vadd.xlane.f32.xlu1 %v318_v34  ;;  %v379_v6 = vmul.f32 %v371_v42, %v278_v46 }
  0xe1   : > { %v401_v9 = vsel %vm287_vm0, %v379_v6, 0.0 }
  0xe6   : > { %334 = vadd.xlane.f32.xlu0 %v333_v43  ;;  %331 = vadd.xlane.f32.xlu2 %v330_v44 }
  0xe7   : > { %328 = vadd.xlane.f32.xlu1 %v327_v45 }
  0xee   : > { %381 = vadd.xlane.f32.xlu0 %v380_v51  ;;  %340 = vadd.xlane.f32.xlu2 %v339_v52 }
  0xef   : > { %337 = vadd.xlane.f32.xlu1 %v336_v53 }
  0xf6   : > { %390 = vadd.xlane.f32.xlu0 %v389_v57  ;;  %387 = vadd.xlane.f32.xlu2 %v386_v58 }
  0xf7   : > { %384 = vadd.xlane.f32.xlu1 %v383_v59 }
  0xfe   : > { %399 = vadd.xlane.f32.xlu0 %v398_v63  ;;  %396 = vadd.xlane.f32.xlu2 %v395_v3 }
  0xff   : > { %393 = vadd.xlane.f32.xlu1 %v392_v4 }
 0x107   : > { %402 = vadd.xlane.f32.xlu1 %v401_v9 }
 0x151   : > { %v326_v10 = vpop.xlane.xlu0 %325  ;;  %v323_v11 = vpop.xlane.xlu2 %322 }
 0x152   : > { %v320_v16 = vpop.xlane.xlu1 %319 }
 0x159   : > { %v335_v17 = vpop.xlane.xlu0 %334  ;;  %v332_v18 = vpop.xlane.xlu2 %331 }
 0x15a   : > { %v329_v21 = vpop.xlane.xlu1 %328 }
 0x161   : > { %v382_v22 = vpop.xlane.xlu0 %381  ;;  %v1179_v23 = vpop.xlane.xlu2 %340 }
 0x162   : > { %v404_v28 = vadd.f32 %v382_v22, %v320_v16  ;;  %v338_v29 = vpop.xlane.xlu1 %337 }
 0x164   : > { %v702_v30 = vmul.f32 -1.442695, %v404_v28 }
 0x166   : > { %767 = vpow2.f32 %v702_v30 }
 0x169   : > { %v391_v31 = vpop.xlane.xlu0 %390  ;;  %v388_v32 = vpop.xlane.xlu2 %387 }
 0x16a   : > { %v407_v33 = vadd.f32 %v391_v31, %v329_v21  ;;  %v406_v34 = vadd.f32 %v388_v32, %v326_v10  ;;  %v385_v35 = vpop.xlane.xlu1 %384 }
 0x16b   : > { %v405_v36 = vadd.f32 %v385_v35, %v323_v11 }
 0x16c   : > { %v768_v37 = vpop.eup %767  ;;  %v705_v38 = vmul.f32 -1.442695, %v407_v33  ;;  %v704_v39 = vmul.f32 -1.442695, %v406_v34 }
 0x16d   : > { %v436_v40 = vadd.f32 1.0, %v768_v37  ;;  %v703_v41 = vmul.f32 -1.442695, %v405_v36 }
 0x16e   : > { %769 = vpow2.f32 %v705_v38 }
 0x16f   : > { %771 = vrcp.f32 %v436_v40  ;;  %v453_v57 = vand.u32 2147483647, %v436_v40  ;;  %v455_v61 = vand.u32 2147483648, %v436_v40  ;;  %vm449_vm2 = vweird.f32 %v436_v40 }
 0x170   : > { %773 = vpow2.f32 %v704_v39 }
 0x171   : > { %775 = vpow2.f32 %v703_v41  ;;  %v400_v42 = vpop.xlane.xlu0 %399  ;;  %v397_v43 = vpop.xlane.xlu2 %396  ;;  %vm454_vm3 = vcmp.eq.f32.partialorder %v453_v57, 8.507059e+37  ;;  %v456_v10 = vor.u32 1.1754944e-38, %v455_v61 }
 0x172   : > { %v410_v44 = vadd.f32 %v400_v42, %v338_v29  ;;  %v409_v45 = vadd.f32 %v397_v43, %v335_v17  ;;  %v394_v46 = vpop.xlane.xlu1 %393 }
 0x173   : > { %v408_v47 = vadd.f32 %v394_v46, %v332_v18 }
 0x174   : > { %v770_v48 = vpop.eup %769  ;;  %v708_v49 = vmul.f32 -1.442695, %v410_v44  ;;  %v707_v50 = vmul.f32 -1.442695, %v409_v45 }
 0x175   : > { %v772_v51 = vpop.eup %771  ;;  %v1181_v52 = vadd.f32 1.0, %v770_v48  ;;  %v706_v53 = vmul.f32 -1.442695, %v408_v47 }
 0x176   : > { %v774_v54 = vpop.eup %773  ;;  %v445_v55 = vmul.f32 %v772_v51, %v436_v40  ;;  %777 = vpow2.f32 %v708_v49  ;;  %vm450_vm1 = vweird.f32 %v772_v51 }
 0x177   : > { %v776_v56 = vpop.eup %775  ;;  %779 = vrcp.f32 %v1181_v52  ;;  %v1184_v59 = vadd.f32 1.0, %v774_v54  ;;  %v498_v63 = vand.u32 2147483647, %v1181_v52  ;;  %v500_v3 = vand.u32 2147483648, %v1181_v52  ;;  %vm451_vm4 = vmor %vm449_vm2, %vm450_vm1 }
 0x178   : > { %v446_v58 = vsub.f32 1.0, %v445_v55  ;;  %v1186_v60 = vadd.f32 1.0, %v776_v56  ;;  %781 = vpow2.f32 %v707_v50  ;;  %vm494_vm5 = vweird.f32 %v1181_v52 }
 0x179   : > { %783 = vpow2.f32 %v706_v53  ;;  %v483_v11 = vand.u32 2147483647, %v1184_v59  ;;  %vm1197_vm6 = vcmp.eq.f32.partialorder %v498_v63, 8.507059e+37  ;;  %v501_v28 = vor.u32 1.1754944e-38, %v500_v3 }
 0x17a   : > { %v447_v62 = vmul.f32 %v772_v51, %v446_v58  ;;  %785 = vrcp.f32 %v1184_v59  ;;  %vm479_vm7 = vweird.f32 %v1184_v59  ;;  %v485_v31 = vand.u32 2147483648, %v1184_v59  ;;  %v403_v37 = vpop.xlane.xlu1 %402 }
 0x17b   : > { %787 = vrcp.f32 %v1186_v60  ;;  %vm464_vm8 = vweird.f32 %v1186_v60  ;;  %v468_v35 = vand.u32 2147483647, %v1186_v60  ;;  %vm1209_vm10 = vcmp.eq.f32.partialorder %v483_v11, 8.507059e+37 }
 0x17c   : > { %v778_v4 = vpop.eup %777  ;;  %v448_v6 = vadd.f32 %v772_v51, %v447_v62  ;;  %v470_v41 = vand.u32 2147483648, %v1186_v60  ;;  %v486_v48 = vor.u32 1.1754944e-38, %v485_v31  ;;  %v411_v49 = vadd.f32 %v403_v37, %v1179_v23 }
 0x17d   : > { %v780_v9 = vpop.eup %779  ;;  %v1194_v16 = vadd.f32 1.0, %v778_v4  ;;  %vm1226_vm11 = vcmp.eq.f32.partialorder %v468_v35, 8.507059e+37 }
 0x17e   : > { %v782_v17 = vpop.eup %781  ;;  %v452_v18 = vsel %vm451_vm4, %v772_v51, %v448_v6  ;;  %v490_v21 = vmul.f32 %v780_v9, %v1181_v52  ;;  %vm495_vm9 = vweird.f32 %v780_v9  ;;  %v471_v62 = vor.u32 1.1754944e-38, %v470_v41 }
 0x17f   : > { %v784_v29 = vpop.eup %783  ;;  %v457_v30 = vsel %vm454_vm3, %v456_v10, %v452_v18  ;;  %789 = vrcp.f32 %v1194_v16  ;;  %v1206_v36 = vadd.f32 1.0, %v782_v17  ;;  %vm496_vm12 = vmor %vm494_vm5, %vm495_vm9  ;;  %v545_v54 = vand.u32 2147483648, %v1194_v16 }
 0x180   : > { %v786_v32 = vpop.eup %785  ;;  %v564_v33 = vadd.f32 1.0, %v457_v30  ;;  %v491_v34 = vsub.f32 1.0, %v490_v21  ;;  %v1214_v42 = vadd.f32 1.0, %v784_v29  ;;  %vm539_vm15 = vweird.f32 %v1194_v16 }
 0x181   : > { %v788_v38 = vpop.eup %787  ;;  %v475_v39 = vmul.f32 %v786_v32, %v1184_v59  ;;  %791 = vrcp.f32 %v1206_v36  ;;  %vm480_vm13 = vweird.f32 %v786_v32  ;;  %v546_v10 = vor.u32 1.1754944e-38, %v545_v54 }
 0x182   : > { %v572_v43 = vmul.f32 %v564_v33, %v1020_v0  ;;  %v573_v44 = vmul.f32 %v564_v33, %v1023_v1  ;;  %v492_v45 = vmul.f32 %v780_v9, %v491_v34  ;;  %v460_v46 = vmul.f32 %v788_v38, %v1186_v60  ;;  %vm481_vm0 = vmor %vm479_vm7, %vm480_vm13 }
 0x183   : > { %v476_v47 = vsub.f32 1.0, %v475_v39  ;;  %v543_v1 = vand.u32 2147483647, %v1194_v16  ;;  %793 = vrcp.f32 %v1214_v42  ;;  %vm465_vm14 = vweird.f32 %v788_v38 }
 0x184   : > { %588 = vst [vmem:[%s1223_s23] sm:$0xff] %v572_v43  ;;  %v493_v50 = vadd.f32 %v780_v9, %v492_v45  ;;  %v461_v51 = vsub.f32 1.0, %v460_v46  ;;  %vm466_vm2 = vmor %vm464_vm8, %vm465_vm14  ;;  %v709_v11 = vmul.f32 -1.442695, %v411_v49  ;;  %v515_v41 = vand.u32 2147483648, %v1214_v42 }
 0x185   : > { %v790_v53 = vpop.eup %789  ;;  %589 = vst [vmem:[%s1223_s23 + $0x8] sm:$0xff] %v573_v44  ;;  %v477_v23 = vmul.f32 %v786_v32, %v476_v47  ;;  %vm1243_vm1 = vcmp.eq.f32.partialorder %v543_v1, 8.507059e+37  ;;  %vm524_vm7 = vweird.f32 %v1206_v36 }
 0x186   : > { %v497_v55 = vsel %vm496_vm12, %v780_v9, %v493_v50  ;;  %v462_v56 = vmul.f32 %v788_v38, %v461_v51  ;;  %v535_v57 = vmul.f32 %v790_v53, %v1194_v16  ;;  %vm540_vm3 = vweird.f32 %v790_v53 }
 0x187   : > { %v502_v58 = vsel %vm1197_vm6, %v501_v28, %v497_v55  ;;  %v478_v61 = vadd.f32 %v786_v32, %v477_v23  ;;  %v792_v6 = vpop.eup %791  ;;  %vm541_vm4 = vmor %vm539_vm15, %vm540_vm3  ;;  %795 = vpow2.f32 %v709_v11  ;;  %v516_v50 = vor.u32 1.1754944e-38, %v515_v41 }
 0x188   : > { %v567_v52 = vadd.f32 1.0, %v502_v58  ;;  %v463_v63 = vadd.f32 %v788_v38, %v462_v56  ;;  %v536_v3 = vsub.f32 1.0, %v535_v57  ;;  %v520_v60 = vmul.f32 %v792_v6, %v1206_v36 }
 0x189   : > { %v482_v9 = vsel %vm481_vm0, %v786_v32, %v478_v61  ;;  %v794_v22 = vpop.eup %793  ;;  %v528_v32 = vand.u32 2147483647, %v1206_v36  ;;  %vm525_vm5 = vweird.f32 %v792_v6 }
 0x18a   : > { %v578_v17 = vmul.f32 %v567_v52, %v1050_v12  ;;  %v579_v59 = vmul.f32 %v567_v52, %v1053_v13  ;;  %v487_v18 = vsel %vm1209_vm10, %v486_v48, %v482_v9  ;;  %v467_v21 = vsel %vm466_vm2, %v788_v38, %v463_v63  ;;  %vm526_vm8 = vmor %vm524_vm7, %vm525_vm5 }
 0x18b   : > { %v566_v28 = vadd.f32 1.0, %v487_v18  ;;  %v472_v29 = vsel %vm1226_vm11, %v471_v62, %v467_v21  ;;  %v537_v30 = vmul.f32 %v790_v53, %v536_v3  ;;  %v530_v12 = vand.u32 2147483648, %v1206_v36 }
 0x18c   : > { %594 = vst [vmem:[%s1223_s23 + $0x30] sm:$0xff] %v578_v17  ;;  %v565_v31 = vadd.f32 1.0, %v472_v29  ;;  %v505_v13 = vmul.f32 %v794_v22, %v1214_v42  ;;  %v521_v37 = vsub.f32 1.0, %v520_v60  ;;  %vm510_vm6 = vweird.f32 %v794_v22 }
 0x18d   : > { %595 = vst [vmem:[%s1223_s23 + $0x38] sm:$0xff] %v579_v59  ;;  %v576_v33 = vmul.f32 %v566_v28, %v1026_v2  ;;  %v577_v34 = vmul.f32 %v566_v28, %v1033_v5  ;;  %v538_v35 = vadd.f32 %v790_v53, %v537_v30  ;;  %vm529_vm9 = vcmp.eq.f32.partialorder %v528_v32, 8.507059e+37  ;;  %v796_v0 = vpop.eup %795 }
 0x18e   : > { %v574_v38 = vmul.f32 %v565_v31, %v1038_v7  ;;  %v575_v39 = vmul.f32 %v565_v31, %v1041_v8  ;;  %v506_v40 = vsub.f32 1.0, %v505_v13  ;;  %v522_v2 = vmul.f32 %v792_v6, %v521_v37 }
 0x18f   : > { %592 = vst [vmem:[%s1223_s23 + $0x20] sm:$0xff] %v576_v33  ;;  %v542_v43 = vsel %vm541_vm4, %v790_v53, %v538_v35  ;;  %v513_v8 = vand.u32 2147483647, %v1214_v42  ;;  %v531_v45 = vor.u32 1.1754944e-38, %v530_v12  ;;  %vm509_vm10 = vweird.f32 %v1214_v42 }
 0x190   : > { %593 = vst [vmem:[%s1223_s23 + $0x28] sm:$0xff] %v577_v34  ;;  %v547_v5 = vsel %vm1243_vm1, %v546_v10, %v542_v43  ;;  %v507_v7 = vmul.f32 %v794_v22, %v506_v40  ;;  %v523_v44 = vadd.f32 %v792_v6, %v522_v2  ;;  %vm511_vm11 = vmor %vm509_vm10, %vm510_vm6  ;;  %v443_v42 = vadd.f32 1.0, %v796_v0 }
 0x191   : > { %590 = vst [vmem:[%s1223_s23 + $0x10] sm:$0xff] %v574_v38  ;;  %v570_v16 = vadd.f32 1.0, %v547_v5  ;;  %vm514_vm12 = vcmp.eq.f32.partialorder %v513_v8, 8.507059e+37 }
 0x192   : > { %591 = vst [vmem:[%s1223_s23 + $0x18] sm:$0xff] %v575_v39  ;;  %v508_v46 = vadd.f32 %v794_v22, %v507_v7  ;;  %v527_v49 = vsel %vm526_vm8, %v792_v6, %v523_v44  ;;  %797 = vrcp.f32 %v443_v42  ;;  %v560_v61 = vand.u32 2147483648, %v443_v42 }
 0x193   : > { %v584_v47 = vmul.f32 %v570_v16, %v1080_v24  ;;  %v585_v48 = vmul.f32 %v570_v16, %v1083_v25  ;;  %v532_v51 = vsel %vm529_vm9, %v531_v45, %v527_v49  ;;  %vm554_vm14 = vweird.f32 %v443_v42 }
 0x194   : > { %v512_v36 = vsel %vm511_vm11, %v794_v22, %v508_v46  ;;  %v569_v1 = vadd.f32 1.0, %v532_v51 }
 0x195   : > { %600 = vst [vmem:[%s1223_s23 + $0x60] sm:$0xff] %v584_v47  ;;  %v517_v53 = vsel %vm514_vm12, %v516_v50, %v512_v36 }
 0x196   : > { %601 = vst [vmem:[%s1223_s23 + $0x68] sm:$0xff] %v585_v48  ;;  %v568_v24 = vadd.f32 1.0, %v517_v53  ;;  %v582_v25 = vmul.f32 %v569_v1, %v1068_v19  ;;  %v583_v23 = vmul.f32 %v569_v1, %v1071_v20  ;;  %v558_v19 = vand.u32 2147483647, %v443_v42 }
 0x198   : > { %v580_v54 = vmul.f32 %v568_v24, %v1056_v14  ;;  %v581_v55 = vmul.f32 %v568_v24, %v1059_v15  ;;  %598 = vst [vmem:[%s1223_s23 + $0x50] sm:$0xff] %v582_v25  ;;  %v798_v56 = vpop.eup %797  ;;  %v561_v14 = vor.u32 1.1754944e-38, %v560_v61  ;;  %vm559_vm0 = vcmp.eq.f32.partialorder %v558_v19, 8.507059e+37 }
 0x199   : > { %599 = vst [vmem:[%s1223_s23 + $0x58] sm:$0xff] %v583_v23  ;;  %v550_v57 = vmul.f32 %v798_v56, %v443_v42  ;;  %vm555_vm13 = vweird.f32 %v798_v56 }
 0x19a   : > { %596 = vst [vmem:[%s1223_s23 + $0x40] sm:$0xff] %v580_v54  ;;  %vm556_vm15 = vmor %vm554_vm14, %vm555_vm13 }
 0x19b   : > { %597 = vst [vmem:[%s1223_s23 + $0x48] sm:$0xff] %v581_v55  ;;  %v551_v58 = vsub.f32 1.0, %v550_v57 }
 0x19d   : > { %v552_v62 = vmul.f32 %v798_v56, %v551_v58 }
 0x19f   : > { %v553_v20 = vadd.f32 %v798_v56, %v552_v62 }
 0x1a1   : > { %v557_v15 = vsel %vm556_vm15, %v798_v56, %v553_v20 }
 0x1a2   : > { %v562_v52 = vsel %vm559_vm0, %v561_v14, %v557_v15 }
 0x1a3   : > { %v571_v63 = vadd.f32 1.0, %v562_v52 }
 0x1a5   : > { %v586_v3 = vmul.f32 %v571_v63, %v1086_v26  ;;  %v587_v4 = vmul.f32 %v571_v63, %v1089_v27 }
 0x1a7   : > { %602 = vst [vmem:[%s1223_s23 + $0x70] sm:$0xff] %v586_v3 }
 0x1a8   : > { %603 = vst [vmem:[%s1223_s23 + $0x78] sm:$0xff] %v587_v4 }
 0x1a9   : > { %856 = shalt.err (!%p853_p4)
}
 0x1aa   : > { %s899_s29 = smov 256   ;;  %s900_s28 = smov 16  }
 0x1ab   : > { %719 = dma.vmem_to_hbm [thread:$0]  (%p971_p11), %s618_s9, 2048, %s620_s16, %s605_s10, %s899_s29, %s899_s29, %s900_s28  }
 0x1ac PF: > { %s634_s4 = sand.u32 1, %s883_s12   ;;  %p1346_p7 = scmp.ge.s32.totalorder %s895_s15, 2 }
 0x1ad   : > { %s635_s6 = scalar_lea.sflag [#allocation4], %s634_s4 }
 0x1ae   : > { %p726_p5 = pnand %p1346_p7, %p975_p12 }
 0x1b0   : > { %p727_p8 = pneg %p726_p5 }
 0x1b2   : > { %878 = dma.done.wait (%p727_p8), %s635_s6, 2048  }
 0x1b3   : > { %880 = vsyncadd (%p727_p8), %s635_s6, 4294965248  ;;  %p16_p10 = scmp.ge.s32.totalorder %s946_s18, 4   ;;  %s1347_s12 = smov %s887_s13 }
 0x1b4   : > { %s1348_s13 = smov %s891_s14  ;;  %s1349_s14 = smov %s958_s21 }
 0x1b5   : > { %s1350_s15 = smov %s946_s18  ;;  %18 = sbr.rel (!%p16_p10) target bundleno = 5 (0x5), region = 77 }
 0x1ba   :  { %641 = vsyncpa [#allocation3], 1 }
 0x1bb   :  { %643 = vsyncpa [#allocation3 + $0x1], 1 }
 0x1bc   :  { %644 = vsyncpa [#allocation4], 1 }
 0x1bd   :  { %646 = vsyncpa [#allocation4 + $0x1], 1 }

</bundles_post_ra>
